<compile_context>
chip_gen: v5e
topology: v5e:2x2
jax: 0.10.0
libtpu: 0.0.40
codegen_flags: <defaults>
</compile_context>

<pallas_src>
import functools

import jax
import jax.numpy as jnp
from jax.experimental import pallas as pl
from jax.experimental.pallas import tpu as pltpu


def _fused_conv_block_kernel(x_ref, wt1_ref, b1_ref, wt2_ref, b2_ref, g_ref,
                             o_ref, *, H, W, Cout, use_pixel_norm,
                             matmul_dtype):
    """Fused ConvBlock forward for one image.

    x_ref  : (1, H, W*Cin)         channels-last, W*Cin on the lane axis
    wt1_ref: (3, W*Cin,  W*Cout)   banded block-Toeplitz weights (row tap kh)
    b1_ref : (1, W*Cout)
    wt2_ref: (3, W*Cout, W*Cout)
    b2_ref : (1, W*Cout)
    g_ref  : (W*Cout, W*Cout)      block-diagonal channel-averaging matrix
    o_ref  : (1, H, W*Cout)
    """

    def conv3x3(xf, wt_ref, b_ref):
        # H-direction zero padding: two zero rows on the sublane axis.
        zrow = jnp.zeros((1, xf.shape[1]), jnp.float32)
        xp = jnp.concatenate([zrow, xf, zrow], axis=0).astype(matmul_dtype)
        # Bias folded into the accumulator init (saves a separate VPU add).
        acc = jnp.broadcast_to(b_ref[...], (H, W * Cout)).astype(jnp.float32)
        for kh in range(3):                     # 3 row taps -> 3 MXU matmuls
            acc = acc + jnp.dot(xp[kh:kh + H, :], wt_ref[kh],
                                preferred_element_type=jnp.float32)
        return acc

    def leaky(v):
        # slope 0.2 < 1  =>  leaky_relu(v) == max(v, 0.2*v)
        return jnp.maximum(v, 0.2 * v)

    def pixel_norm(v):
        # mean(v^2) over channels, broadcast back over channels, via one matmul
        ms = jnp.dot(v * v, g_ref[...], preferred_element_type=jnp.float32)
        return v * jax.lax.rsqrt(ms + 1e-8)     # rsqrt -> EUP slot

    x = x_ref[0].astype(jnp.float32)            # (H, W*Cin)
    y = leaky(conv3x3(x, wt1_ref, b1_ref))
    if use_pixel_norm:
        y = pixel_norm(y)
    y = leaky(conv3x3(y, wt2_ref, b2_ref))      # intermediate stays in VMEM/f32
    if use_pixel_norm:
        y = pixel_norm(y)
    o_ref[0] = y.astype(o_ref.dtype)            # dense 128-lane store


def _banded_toeplitz_weight(w_hwio, scale, W_sp, dtype):
    """(3,3,Cin,Cout) conv weight -> (3, W*Cin, W*Cout) banded block-Toeplitz.

    WT[kh, q*Cin+ci, w*Cout+co] = scale * w[kh, kw, ci, co]  where q = w+kw-1,
    zero outside the band (this realizes the pad=1 zero padding along W).
    """
    KH, KW, Cin, Cout = w_hwio.shape
    w = w_hwio.astype(jnp.float32) * jnp.float32(scale)
    q = jnp.arange(W_sp)
    wpos = jnp.arange(W_sp)
    kw = jnp.arange(KW)
    sel = (q[None, :, None] ==
           (wpos[None, None, :] + kw[:, None, None] - 1)).astype(jnp.float32)
    wt = jnp.einsum('kqw,hkio->hqiwo', sel, w)      # (KH, W, Cin, W, Cout)
    return wt.reshape(KH, W_sp * Cin, W_sp * Cout).astype(dtype)


def conv_block_forward(x_nchw, params, use_pixel_norm=True,
                       matmul_dtype=jnp.float32):
    """Full ConvBlock forward. x_nchw: (N, Cin, H, W) -> (N, Cout, H, W)."""
    w1, b1, w2, b2 = params["w1"], params["b1"], params["w2"], params["b2"]
    N, Cin, H, W = x_nchw.shape
    Cout = w1.shape[3]
    scale1 = (2.0 / (Cin * 9)) ** 0.5
    scale2 = (2.0 / (Cout * 9)) ** 0.5

    # NCHW -> (N, H, W*Cin): channels-last, flattened so the lane axis is dense.
    xf = jnp.transpose(x_nchw, (0, 2, 3, 1)).reshape(N, H, W * Cin)

    wt1 = _banded_toeplitz_weight(w1, scale1, W, matmul_dtype)
    wt2 = _banded_toeplitz_weight(w2, scale2, W, matmul_dtype)
    b1f = jnp.tile(b1.astype(jnp.float32), W).reshape(1, W * Cout)
    b2f = jnp.tile(b2.astype(jnp.float32), W).reshape(1, W * Cout)
    # Block-diagonal channel-averaging matrix for PixelNorm.
    g = jnp.kron(jnp.eye(W, dtype=jnp.float32),
                 jnp.full((Cout, Cout), 1.0 / Cout, jnp.float32))

    kernel = functools.partial(
        _fused_conv_block_kernel, H=H, W=W, Cout=Cout,
        use_pixel_norm=use_pixel_norm, matmul_dtype=matmul_dtype)

    yf = pl.pallas_call(
        kernel,
        out_shape=jax.ShapeDtypeStruct((N, H, W * Cout), x_nchw.dtype),
        grid_spec=pltpu.PrefetchScalarGridSpec(
            num_scalar_prefetch=0,
            grid=(N,),
            in_specs=[
                pl.BlockSpec((1, H, W * Cin), lambda n: (n, 0, 0)),
                pl.BlockSpec((3, W * Cin, W * Cout), lambda n: (0, 0, 0)),
                pl.BlockSpec((1, W * Cout), lambda n: (0, 0)),
                pl.BlockSpec((3, W * Cout, W * Cout), lambda n: (0, 0, 0)),
                pl.BlockSpec((1, W * Cout), lambda n: (0, 0)),
                pl.BlockSpec((W * Cout, W * Cout), lambda n: (0, 0)),
            ],
            out_specs=pl.BlockSpec((1, H, W * Cout), lambda n: (n, 0, 0)),
        ),
        compiler_params=pltpu.CompilerParams(
            dimension_semantics=("parallel",),          # 2x on v7x dual-TC
            vmem_limit_bytes=32 * 1024 * 1024,
        ),
    )(xf, wt1, b1f, wt2, b2f, g)

    # (N, H, W*Cout) -> NCHW for PyTorch-compatible output.
    return jnp.transpose(yf.reshape(N, H, W, Cout), (0, 3, 1, 2))


# ---------------------------------------------------------------------------
# Plain-JAX reference (sanity check of the Pallas kernel).
# ---------------------------------------------------------------------------
def _reference_forward(x_nchw, params, use_pixel_norm=True):
    def ws_conv(x, w_hwio, b, scale):
        w_oihw = jnp.transpose(w_hwio, (3, 2, 0, 1))  # -> (Cout, Cin, kh, kw)
        y = jax.lax.conv_general_dilated(
            x * scale, w_oihw, window_strides=(1, 1), padding=((1, 1), (1, 1)),
            dimension_numbers=("NCHW", "OIHW", "NCHW"),
            precision=jax.lax.Precision.HIGHEST)
        return y + b[None, :, None, None]

    def leaky(x):
        return jnp.where(x > 0, x, 0.2 * x)

    def pn(x):
        return x / jnp.sqrt(jnp.mean(x * x, axis=1, keepdims=True) + 1e-8)

    cin = params["w1"].shape[2]
    cout = params["w1"].shape[3]
    s1 = (2.0 / (cin * 9)) ** 0.5
    s2 = (2.0 / (cout * 9)) ** 0.5

    x = leaky(ws_conv(x_nchw, params["w1"], params["b1"], s1))
    x = pn(x) if use_pixel_norm else x
    x = leaky(ws_conv(x, params["w2"], params["b2"], s2))
    x = pn(x) if use_pixel_norm else x
    return x


if __name__ == "__main__":
    # Small shapes consistent with the module: N=2, Cin=4, Cout=8, H=W=16.
    N, CIN, COUT, H, W = 2, 4, 8, 16, 16

    key = jax.random.PRNGKey(0)
    kx, kw1, kw2, kb1, kb2 = jax.random.split(key, 5)

    x = jax.random.normal(kx, (N, CIN, H, W), dtype=jnp.float32)

    # Weights stored HWIO (kh, kw, Cin, Cout).  Small non-zero biases so the
    # bias path is actually exercised (forward semantics do not depend on the
    # init values).
    params = {
        "w1": jax.random.normal(kw1, (3, 3, CIN, COUT), dtype=jnp.float32),
        "b1": 0.1 * jax.random.normal(kb1, (COUT,), dtype=jnp.float32),
        "w2": jax.random.normal(kw2, (3, 3, COUT, COUT), dtype=jnp.float32),
        "b2": 0.1 * jax.random.normal(kb2, (COUT,), dtype=jnp.float32),
    }

    # f32 path, with and without PixelNorm: strict check against the reference.
    for use_pn in (True, False):
        out = jax.block_until_ready(conv_block_forward(x, params, use_pn))
        ref = _reference_forward(x, params, use_pn)
        assert out.shape == (N, COUT, H, W)
        assert jnp.allclose(out, ref, atol=1e-3, rtol=1e-3), \
            f"mismatch (use_pixel_norm={use_pn})"

    # bf16 MXU inputs / f32 accumulation (v6e/v7x fast path): loose check.
    out_bf16 = jax.block_until_ready(
        conv_block_forward(x, params, True, matmul_dtype=jnp.bfloat16))
    ref = _reference_forward(x, params, True)
    assert jnp.allclose(out_bf16, ref, atol=1e-1, rtol=1e-1), "bf16 mismatch"

    print("KERNEL_OK")
</pallas_src>

<mosaic_0001>
module attributes {stable_mosaic.version = 11 : i64} {
  func.func @_fused_conv_block_kernel(%arg0: i32, %arg1: memref<1x16x64xf32, #tpu.memory_space<vmem>>, %arg2: memref<3x64x128xf32, #tpu.memory_space<vmem>>, %arg3: memref<1x128xf32, #tpu.memory_space<vmem>>, %arg4: memref<3x128x128xf32, #tpu.memory_space<vmem>>, %arg5: memref<1x128xf32, #tpu.memory_space<vmem>>, %arg6: memref<128x128xf32, #tpu.memory_space<vmem>>, %arg7: memref<1x16x128xf32, #tpu.memory_space<vmem>>) attributes {dimension_semantics = [#tpu.dimension_semantics<parallel>], iteration_bounds = array<i64: 2>, scalar_prefetch = 0 : i64, scratch_operands = 0 : i64, tpu.core_type = #tpu.core_type<tc>, window_params = [{transform_indices = @transform_0, window_bounds = array<i64: 1, 16, 64>}, {pipeline_mode = #tpu.pipeline_mode<synchronous>, transform_indices = @transform_1, window_bounds = array<i64: 3, 64, 128>}, {pipeline_mode = #tpu.pipeline_mode<synchronous>, transform_indices = @transform_2, window_bounds = array<i64: 1, 128>}, {pipeline_mode = #tpu.pipeline_mode<synchronous>, transform_indices = @transform_3, window_bounds = array<i64: 3, 128, 128>}, {pipeline_mode = #tpu.pipeline_mode<synchronous>, transform_indices = @transform_4, window_bounds = array<i64: 1, 128>}, {pipeline_mode = #tpu.pipeline_mode<synchronous>, transform_indices = @transform_5, window_bounds = array<i64: 128, 128>}, {transform_indices = @transform_6, window_bounds = array<i64: 1, 16, 128>}]} {
    %c0 = arith.constant 0 : index
    %c0_0 = arith.constant 0 : index
    %c0_1 = arith.constant 0 : index
    %0 = vector.load %arg1[%c0, %c0_0, %c0_1] : memref<1x16x64xf32, #tpu.memory_space<vmem>>, vector<1x16x64xf32>
    %1 = vector.shape_cast %0 : vector<1x16x64xf32> to vector<16x64xf32>
    %cst = arith.constant 0.000000e+00 : f32
    %2 = vector.broadcast %cst : f32 to vector<1x64xf32>
    %3 = tpu.concatenate %2, %1, %2 in 0 : vector<1x64xf32>, vector<16x64xf32>, vector<1x64xf32> -> vector<18x64xf32>
    %c0_2 = arith.constant 0 : index
    %c0_3 = arith.constant 0 : index
    %4 = vector.load %arg3[%c0_2, %c0_3] : memref<1x128xf32, #tpu.memory_space<vmem>>, vector<1x128xf32>
    %5 = vector.shape_cast %4 : vector<1x128xf32> to vector<1x128xf32>
    %6 = vector.broadcast %5 : vector<1x128xf32> to vector<16x128xf32>
    %7 = vector.extract_strided_slice %3 {offsets = [0, 0], sizes = [16, 64], strides = [1, 1]} : vector<18x64xf32> to vector<16x64xf32>
    %c0_4 = arith.constant 0 : index
    %c0_5 = arith.constant 0 : index
    %c0_6 = arith.constant 0 : index
    %8 = vector.load %arg2[%c0_4, %c0_5, %c0_6] : memref<3x64x128xf32, #tpu.memory_space<vmem>>, vector<1x64x128xf32>
    %9 = vector.shape_cast %8 : vector<1x64x128xf32> to vector<64x128xf32>
    %cst_7 = arith.constant dense<0.000000e+00> : vector<16x128xf32>
    %10 = tpu.matmul %7, %9, %cst_7 {dimension_numbers = #tpu.dot_dimension_numbers<[1], [0], [0], [1], [0, 0, 1, 1], [], []>} : vector<16x64xf32>, vector<64x128xf32>, vector<16x128xf32> -> vector<16x128xf32>
    %11 = arith.addf %6, %10 : vector<16x128xf32>
    %12 = vector.extract_strided_slice %3 {offsets = [1, 0], sizes = [16, 64], strides = [1, 1]} : vector<18x64xf32> to vector<16x64xf32>
    %c1 = arith.constant 1 : index
    %c0_8 = arith.constant 0 : index
    %c0_9 = arith.constant 0 : index
    %13 = vector.load %arg2[%c1, %c0_8, %c0_9] : memref<3x64x128xf32, #tpu.memory_space<vmem>>, vector<1x64x128xf32>
    %14 = vector.shape_cast %13 : vector<1x64x128xf32> to vector<64x128xf32>
    %cst_10 = arith.constant dense<0.000000e+00> : vector<16x128xf32>
    %15 = tpu.matmul %12, %14, %cst_10 {dimension_numbers = #tpu.dot_dimension_numbers<[1], [0], [0], [1], [0, 0, 1, 1], [], []>} : vector<16x64xf32>, vector<64x128xf32>, vector<16x128xf32> -> vector<16x128xf32>
    %16 = arith.addf %11, %15 : vector<16x128xf32>
    %17 = vector.extract_strided_slice %3 {offsets = [2, 0], sizes = [16, 64], strides = [1, 1]} : vector<18x64xf32> to vector<16x64xf32>
    %c2 = arith.constant 2 : index
    %c0_11 = arith.constant 0 : index
    %c0_12 = arith.constant 0 : index
    %18 = vector.load %arg2[%c2, %c0_11, %c0_12] : memref<3x64x128xf32, #tpu.memory_space<vmem>>, vector<1x64x128xf32>
    %19 = vector.shape_cast %18 : vector<1x64x128xf32> to vector<64x128xf32>
    %cst_13 = arith.constant dense<0.000000e+00> : vector<16x128xf32>
    %20 = tpu.matmul %17, %19, %cst_13 {dimension_numbers = #tpu.dot_dimension_numbers<[1], [0], [0], [1], [0, 0, 1, 1], [], []>} : vector<16x64xf32>, vector<64x128xf32>, vector<16x128xf32> -> vector<16x128xf32>
    %21 = arith.addf %16, %20 : vector<16x128xf32>
    %cst_14 = arith.constant 2.000000e-01 : f32
    %22 = vector.broadcast %cst_14 : f32 to vector<16x128xf32>
    %23 = arith.mulf %22, %21 : vector<16x128xf32>
    %24 = arith.maximumf %21, %23 : vector<16x128xf32>
    %25 = arith.mulf %24, %24 : vector<16x128xf32>
    %c0_15 = arith.constant 0 : index
    %c0_16 = arith.constant 0 : index
    %26 = vector.load %arg6[%c0_15, %c0_16] : memref<128x128xf32, #tpu.memory_space<vmem>>, vector<128x128xf32>
    %cst_17 = arith.constant dense<0.000000e+00> : vector<16x128xf32>
    %27 = tpu.matmul %25, %26, %cst_17 {dimension_numbers = #tpu.dot_dimension_numbers<[1], [0], [0], [1], [0, 0, 1, 1], [], []>} : vector<16x128xf32>, vector<128x128xf32>, vector<16x128xf32> -> vector<16x128xf32>
    %cst_18 = arith.constant 9.99999993E-9 : f32
    %28 = vector.broadcast %cst_18 : f32 to vector<16x128xf32>
    %29 = arith.addf %27, %28 : vector<16x128xf32>
    %30 = math.rsqrt %29 : vector<16x128xf32>
    %31 = arith.mulf %24, %30 : vector<16x128xf32>
    %cst_19 = arith.constant 0.000000e+00 : f32
    %32 = vector.broadcast %cst_19 : f32 to vector<1x128xf32>
    %33 = tpu.concatenate %32, %31, %32 in 0 : vector<1x128xf32>, vector<16x128xf32>, vector<1x128xf32> -> vector<18x128xf32>
    %c0_20 = arith.constant 0 : index
    %c0_21 = arith.constant 0 : index
    %34 = vector.load %arg5[%c0_20, %c0_21] : memref<1x128xf32, #tpu.memory_space<vmem>>, vector<1x128xf32>
    %35 = vector.shape_cast %34 : vector<1x128xf32> to vector<1x128xf32>
    %36 = vector.broadcast %35 : vector<1x128xf32> to vector<16x128xf32>
    %37 = vector.extract_strided_slice %33 {offsets = [0, 0], sizes = [16, 128], strides = [1, 1]} : vector<18x128xf32> to vector<16x128xf32>
    %c0_22 = arith.constant 0 : index
    %c0_23 = arith.constant 0 : index
    %c0_24 = arith.constant 0 : index
    %38 = vector.load %arg4[%c0_22, %c0_23, %c0_24] : memref<3x128x128xf32, #tpu.memory_space<vmem>>, vector<1x128x128xf32>
    %39 = vector.shape_cast %38 : vector<1x128x128xf32> to vector<128x128xf32>
    %cst_25 = arith.constant dense<0.000000e+00> : vector<16x128xf32>
    %40 = tpu.matmul %37, %39, %cst_25 {dimension_numbers = #tpu.dot_dimension_numbers<[1], [0], [0], [1], [0, 0, 1, 1], [], []>} : vector<16x128xf32>, vector<128x128xf32>, vector<16x128xf32> -> vector<16x128xf32>
    %41 = arith.addf %36, %40 : vector<16x128xf32>
    %42 = vector.extract_strided_slice %33 {offsets = [1, 0], sizes = [16, 128], strides = [1, 1]} : vector<18x128xf32> to vector<16x128xf32>
    %c1_26 = arith.constant 1 : index
    %c0_27 = arith.constant 0 : index
    %c0_28 = arith.constant 0 : index
    %43 = vector.load %arg4[%c1_26, %c0_27, %c0_28] : memref<3x128x128xf32, #tpu.memory_space<vmem>>, vector<1x128x128xf32>
    %44 = vector.shape_cast %43 : vector<1x128x128xf32> to vector<128x128xf32>
    %cst_29 = arith.constant dense<0.000000e+00> : vector<16x128xf32>
    %45 = tpu.matmul %42, %44, %cst_29 {dimension_numbers = #tpu.dot_dimension_numbers<[1], [0], [0], [1], [0, 0, 1, 1], [], []>} : vector<16x128xf32>, vector<128x128xf32>, vector<16x128xf32> -> vector<16x128xf32>
    %46 = arith.addf %41, %45 : vector<16x128xf32>
    %47 = vector.extract_strided_slice %33 {offsets = [2, 0], sizes = [16, 128], strides = [1, 1]} : vector<18x128xf32> to vector<16x128xf32>
    %c2_30 = arith.constant 2 : index
    %c0_31 = arith.constant 0 : index
    %c0_32 = arith.constant 0 : index
    %48 = vector.load %arg4[%c2_30, %c0_31, %c0_32] : memref<3x128x128xf32, #tpu.memory_space<vmem>>, vector<1x128x128xf32>
    %49 = vector.shape_cast %48 : vector<1x128x128xf32> to vector<128x128xf32>
    %cst_33 = arith.constant dense<0.000000e+00> : vector<16x128xf32>
    %50 = tpu.matmul %47, %49, %cst_33 {dimension_numbers = #tpu.dot_dimension_numbers<[1], [0], [0], [1], [0, 0, 1, 1], [], []>} : vector<16x128xf32>, vector<128x128xf32>, vector<16x128xf32> -> vector<16x128xf32>
    %51 = arith.addf %46, %50 : vector<16x128xf32>
    %cst_34 = arith.constant 2.000000e-01 : f32
    %52 = vector.broadcast %cst_34 : f32 to vector<16x128xf32>
    %53 = arith.mulf %52, %51 : vector<16x128xf32>
    %54 = arith.maximumf %51, %53 : vector<16x128xf32>
    %55 = arith.mulf %54, %54 : vector<16x128xf32>
    %c0_35 = arith.constant 0 : index
    %c0_36 = arith.constant 0 : index
    %56 = vector.load %arg6[%c0_35, %c0_36] : memref<128x128xf32, #tpu.memory_space<vmem>>, vector<128x128xf32>
    %cst_37 = arith.constant dense<0.000000e+00> : vector<16x128xf32>
    %57 = tpu.matmul %55, %56, %cst_37 {dimension_numbers = #tpu.dot_dimension_numbers<[1], [0], [0], [1], [0, 0, 1, 1], [], []>} : vector<16x128xf32>, vector<128x128xf32>, vector<16x128xf32> -> vector<16x128xf32>
    %cst_38 = arith.constant 9.99999993E-9 : f32
    %58 = vector.broadcast %cst_38 : f32 to vector<16x128xf32>
    %59 = arith.addf %57, %58 : vector<16x128xf32>
    %60 = math.rsqrt %59 : vector<16x128xf32>
    %61 = arith.mulf %54, %60 : vector<16x128xf32>
    %c0_39 = arith.constant 0 : index
    %c0_40 = arith.constant 0 : index
    %c0_41 = arith.constant 0 : index
    %62 = vector.load %arg7[%c0_39, %c0_40, %c0_41] : memref<1x16x128xf32, #tpu.memory_space<vmem>>, vector<1x16x128xf32>
    %63 = vector.shape_cast %62 : vector<1x16x128xf32> to vector<16x128xf32>
    %64 = vector.shape_cast %61 : vector<16x128xf32> to vector<1x16x128xf32>
    tpu.vector_store %arg7[%c0_39, %c0_40, %c0_41], %64 {strides = array<i32>} : memref<1x16x128xf32, #tpu.memory_space<vmem>>, vector<1x16x128xf32>,
    return
  }
  func.func @transform_0(%arg0: i32) -> (i32, i32, i32) {
    %c0_i32 = arith.constant 0 : i32
    %c0_i32_0 = arith.constant 0 : i32
    %c0_i32_1 = arith.constant 0 : i32
    return %arg0, %c0_i32, %c0_i32_0 : i32, i32, i32
  }
  func.func @transform_1(%arg0: i32) -> (i32, i32, i32) {
    %c0_i32 = arith.constant 0 : i32
    %c0_i32_0 = arith.constant 0 : i32
    %c0_i32_1 = arith.constant 0 : i32
    %c0_i32_2 = arith.constant 0 : i32
    return %c0_i32, %c0_i32_0, %c0_i32_1 : i32, i32, i32
  }
  func.func @transform_2(%arg0: i32) -> (i32, i32) {
    %c0_i32 = arith.constant 0 : i32
    %c0_i32_0 = arith.constant 0 : i32
    %c0_i32_1 = arith.constant 0 : i32
    return %c0_i32, %c0_i32_0 : i32, i32
  }
  func.func @transform_3(%arg0: i32) -> (i32, i32, i32) {
    %c0_i32 = arith.constant 0 : i32
    %c0_i32_0 = arith.constant 0 : i32
    %c0_i32_1 = arith.constant 0 : i32
    %c0_i32_2 = arith.constant 0 : i32
    return %c0_i32, %c0_i32_0, %c0_i32_1 : i32, i32, i32
  }
  func.func @transform_4(%arg0: i32) -> (i32, i32) {
    %c0_i32 = arith.constant 0 : i32
    %c0_i32_0 = arith.constant 0 : i32
    %c0_i32_1 = arith.constant 0 : i32
    return %c0_i32, %c0_i32_0 : i32, i32
  }
  func.func @transform_5(%arg0: i32) -> (i32, i32) {
    %c0_i32 = arith.constant 0 : i32
    %c0_i32_0 = arith.constant 0 : i32
    %c0_i32_1 = arith.constant 0 : i32
    return %c0_i32, %c0_i32_0 : i32, i32
  }
  func.func @transform_6(%arg0: i32) -> (i32, i32, i32) {
    %c0_i32 = arith.constant 0 : i32
    %c0_i32_0 = arith.constant 0 : i32
    %c0_i32_1 = arith.constant 0 : i32
    return %arg0, %c0_i32, %c0_i32_0 : i32, i32, i32
  }
}

</mosaic_0001>

<bundles_post_ra>
// kernel: tpu_custom_call.1
= control target key start
LH: loop header
LB: loop body
LE: loop exit
PB: predicated region body
PF: predicated region fallthrough
CT: control target
= control target key end

     0   :  { %11 = vsyncpa [#allocation3], 0  ;;  %s1441_s0 = inlined_call_operand.hbm [shape: f32[2,16,64], index: 0, kind: input, shape index: {}]   ;;  %s1442_s1 = inlined_call_operand.hbm [shape: f32[3,64,128], index: 1, kind: input, shape index: {}]   ;;  %s1443_s2 = inlined_call_operand.vmem [shape: f32[1,128], index: 2, kind: input, shape index: {}]   ;;  %s1444_s3 = inlined_call_operand.hbm [shape: f32[3,128,128], index: 3, kind: input, shape index: {}]   ;;  %s1445_s4 = inlined_call_operand.vmem [shape: f32[1,128], index: 4, kind: input, shape index: {}]   ;;  %s1446_s5 = inlined_call_operand.hbm [shape: f32[128,128], index: 5, kind: input, shape index: {}]   ;;  %s1447_s6 = inlined_call_operand.hbm [shape: f32[2,16,128], index: 6, kind: output, shape index: {}]  }
   0x1   :  { %13 = vsyncpa [#allocation3 + $0x1], 0 }
   0x2   :  { %14 = vsyncpa [#allocation6], 0 }
   0x3   :  { %15 = vsyncpa [#allocation9], 0 }
   0x4   :  { %16 = vsyncpa [#allocation4], 0 }
   0x5   :  { %18 = vsyncpa [#allocation4 + $0x1], 0  ;;  %s1218_s21 = smov 0   ;;  %s1220_s22 = smov 0  }
   0x6   :  { %s1222_s23 = smov 0   ;;  %s1224_s24 = smov 0  }
   0x7 LB: > { %s1239_s25 = sadd.s32 4294967295, %s1174_s24   ;;  %s859_s26 = sadd.s32 4294967294, %s1174_s24   ;;  %s1174_s24 = sphi %s1224_s24, %s1462_s24   ;;  %s1170_s23 = sphi %s1222_s23, %s1461_s23   ;;  %s1166_s22 = sphi %s1220_s22, %s1460_s22   ;;  %s1162_s21 = sphi %s1218_s21, %s1459_s21  }
   0x8   : > { %p44_p0 = scmp.ne.s32.totalorder %s1166_s22, %s1162_s21  ;;  %p45_p1 = scmp.eq.s32.totalorder %s1239_s25, 0 }
   0x9   : > { %p173_p2 = scmp.eq.s32.totalorder %s1239_s25, 1  ;;  %p179_p3 = scmp.eq.s32.totalorder %s859_s26, 1 }
   0xa   : > { %p1248_p4 = por %p45_p1, %p44_p0  ;;  %p860_p5 = scmp.ge.s32.totalorder %s1174_s24, 1 }
   0xb   : > { %p1253_p6 = por %p179_p3, %p44_p0  ;;  %p186_p7 = scmp.lt.s32.totalorder %s1174_s24, 3 }
   0xc   : > { %s197_s7 = sshll.u32 %s1442_s1, 4  ;;  %s1176_s9 = smov [#allocation5]   ;;  %s198_s7 = int_to_ptr.hbm [resolvable:$true] %s197_s7 }
   0xd   : > { %p1261_p8 = pnand %p860_p5, %p186_p7  ;;  %s199_s10 = sshll.u32 %s1176_s9, 4  ;;  %s200_s10 = int_to_ptr.vmem [resolvable:$true] %s199_s10 }
   0xe   : > { %s214_s14 = sshll.u32 %s1444_s3, 4  ;;  %s1448_s15 = smov 128   ;;  %s215_s14 = int_to_ptr.hbm [resolvable:$true] %s214_s14 }
   0xf   : > { %p905_p9 = pneg %p1261_p8  ;;  %s1449_s16 = smov 8  }
  0x10   : > { %s1179_s17 = smov [#allocation7]   ;;  %s231_s26 = sshll.u32 %s1446_s5, 4  ;;  %s232_s26 = int_to_ptr.hbm [resolvable:$true] %s231_s26 }
  0x11   : > { %p1269_p10 = pnand %p905_p9, %p45_p1  ;;  %s216_s18 = sshll.u32 %s1179_s17, 4  ;;  %s217_s18 = int_to_ptr.vmem [resolvable:$true] %s216_s18 }
  0x12   : > { %s1180_s29 = smov [#allocation8]   ;;  %p38_p13 = scmp.ne.s32.totalorder %s1170_s23, %s1166_s22 }
  0x13   : > { %908 = dma.hbm_to_vmem [thread:$0]  (!%p1269_p10), %s198_s7, 3072, %s200_s10, [#allocation6], %s1448_s15, %s1448_s15, %s1449_s16  }
  0x14   : > { %911 = dma.hbm_to_vmem [thread:$0]  (!%p1269_p10), %s215_s14, 6144, %s217_s18, [#allocation6], %s1448_s15, %s1448_s15, %s1449_s16  }
  0x15   : > { %s233_s30 = sshll.u32 %s1180_s29, 4  ;;  %s1291_s7 = sadd.s32 1, %s1174_s24   ;;  %s234_s30 = int_to_ptr.vmem [resolvable:$true] %s233_s30 }
  0x16   : > { %914 = dma.hbm_to_vmem [thread:$0]  (!%p1269_p10), %s232_s26, 2048, %s234_s30, [#allocation9], %s1448_s15, %s1448_s15, %s1449_s16  }
  0x17   : > { %s28_s9 = ssub.s32 %s1174_s24, %s1291_s7  ;;  %s31_s10 = sadd.s32 1, %s1170_s23 }
  0x18   : > { %p29_p12 = scmp.eq.s32.totalorder %s28_s9, 0  ;;  %p39_p0 = scmp.eq.s32.totalorder %s1174_s24, 0 }
  0x19   : > { %p1309_p3 = por %p173_p2, %p38_p13  ;;  %p926_p5 = scmp.lt.s32.totalorder %s1174_s24, 2 }
  0x1a   : > { %s1305_s12 = scalar_select %p29_p12, %s1170_s23, %s31_s10  }
  0x1b   : > { %s247_s14 = sand.u32 1, %s1170_s23   ;;  %s887_s11 = sshll.u32 %s1174_s24, 4 }
  0x1c   : > { %p40_p7 = por %p39_p0, %p38_p13  ;;  %s865_s17 = sshll.u32 %s247_s14, 4 }
  0x1d   : > { %s256_s20 = scalar_lea.hbm %s1441_s0, %s887_s11  ;;  %s251_s29 = scalar_lea.vmem [#allocation2], %s865_s17 }
  0x1e   : > { %s257_s26 = sshll.u32 %s256_s20, 4  ;;  %s259_s30 = sshll.u32 %s251_s29, 4  ;;  %s258_s26 = int_to_ptr.hbm [resolvable:$true] %s257_s26  ;;  %s260_s30 = int_to_ptr.vmem [resolvable:$true] %s259_s30 }
  0x1f   : > { %p1319_p9 = pnand %p926_p5, %p40_p7  ;;  %s248_s10 = scalar_lea.sflag [#allocation3], %s247_s14 }
  0x20   : > { %s1070_s15 = sshra.s32 %s258_s26, 4  ;;  %s1077_s17 = scalar_lea.hbm %s1441_s0, 32  ;;  %s1071_s15 = int_to_ptr.hbm [resolvable:$true] %s1070_s15 }
  0x21   : > { %s1072_s16 = scalar_lea.hbm %s1071_s15, 16  ;;  %p1074_p10 = pneg %p1319_p9 }
  0x22   : > { %p1073_p2 = scmp.ne.s32.totalorder %s1071_s15, %s1072_s16  ;;  %p1078_p0 = scmp.lt.s32.totalorder %s1071_s15, %s1441_s0 }
  0x23   : > { %p1079_p5 = scmp.lt.s32.totalorder %s1077_s17, %s1072_s16 }
  0x24   : > { %p1075_p12 = pnand %p1074_p10, %p1073_p2 }
  0x25   : > { %p1080_p7 = por %p1079_p5, %p1078_p0 }
  0x26   : > { %p1076_p13 = pneg %p1075_p12 }
  0x28   : > { %p1081_p11 = pnand %p1080_p7, %p1076_p13 }
  0x2a   : > { %1084 = shalt.err (!%p1081_p11)
}
  0x2b   : > { %s1456_s14 = smov 8   ;;  %s1457_s29 = smov 128  }
  0x2c   : > { %918 = dma.hbm_to_vmem [thread:$0]  (!%p1319_p9), %s258_s26, 256, %s260_s30, %s248_s10, %s1457_s29, %s1457_s29, %s1456_s14  }
  0x2d   : > { %271 = sbr.rel (%p1261_p8) target bundleno = 685 (0x2ad), region = 44  ;;  %s1339_s11 = sand.u32 (!%p1261_p8), 1, %s1166_s22  }
  0x2e   : > { %s869_s15 = sshll.u32 (!%p1261_p8), %s1339_s11, 4  ;;  %s274_s16 = scalar_lea.sflag (!%p1261_p8), [#allocation3], %s1339_s11 }
  0x2f   : > { %s1345_s18 = scalar_lea.vmem (!%p1261_p8), [#allocation2], %s869_s15 }
  0x32   : > { %1145 = dma.done.wait (%p1248_p4), %s274_s16, 256  }
  0x33   : > { %1147 = vsyncadd (%p1248_p4), %s274_s16, 4294967040 }
  0x34   : > { %1149 = dma.done.wait (%p45_p1), [#allocation6], 9216  }
  0x35   : > { %1151 = vsyncadd (%p45_p1), [#allocation6], 4294958080 }
  0x36   : > { %1153 = dma.done.wait (%p45_p1), [#allocation9], 2048  }
  0x37   : > { %1155 = vsyncadd (%p45_p1), [#allocation9], 4294965248  ;;  %v430_v0 = vld [vmem:[#allocation5 + $0xb8] sm:$0xff]  ;;  %v429_v2 = vld [vmem:[#allocation5 + $0xb0] sm:$0xff]  ;;  %vm326_vm0 = vcmask 1040384   ;;  %vm431_vm1 = vcmask 1045504  }
  0x38   : > { %v345_v1 = vld [vmem:[#allocation5 + $0x38] sm:$0xff]  ;;  %449 = vmatpush.msra.mxu2 %v430_v0  ;;  %v344_v3 = vld [vmem:[#allocation5 + $0x30] sm:$0xff]  ;;  %v428_v5 = vld [vmem:[#allocation5 + $0xa8] sm:$0xff]  ;;  %vm387_vm2 = vcmask 1046528   ;;  %vm346_vm3 = vcmask 523264   ;;  %s888_s9 = sshll.u32 %s1239_s25, 4 }
  0x39   : > { %360 = vmatpush.msra.mxu0 %v345_v1  ;;  %v385_v4 = vld [vmem:[#allocation5 + $0x78] sm:$0xff]  ;;  %v343_v6 = vld [vmem:[#allocation5 + $0x28] sm:$0xff]  ;;  %v384_v7 = vld [vmem:[#allocation5 + $0x70] sm:$0xff]  ;;  %s753_s19 = scalar_lea.hbm %s1447_s6, %s888_s9  ;;  %s321_s20 = scalar_lea.vmem [#allocation10], %s869_s15 }
  0x3a   : > { %405 = vmatpush.msra.mxu1 %v385_v4  ;;  %450 = vmatpush.msra.mxu2 %v429_v2  ;;  %v383_v8 = vld [vmem:[#allocation5 + $0x68] sm:$0xff]  ;;  %v427_v9 = vld [vmem:[#allocation5 + $0xa0] sm:$0xff]  ;;  %v426_v12 = vld [vmem:[#allocation5 + $0x98] sm:$0xff]  ;;  %s754_s14 = sshll.u32 %s321_s20, 4  ;;  %s756_s29 = sshll.u32 %s753_s19, 4  ;;  %s755_s14 = int_to_ptr.vmem [resolvable:$true] %s754_s14  ;;  %s757_s29 = int_to_ptr.hbm [resolvable:$true] %s756_s29 }
  0x3b   : > { %361 = vmatpush.msra.mxu0 %v344_v3  ;;  %v342_v10 = vld [vmem:[#allocation5 + $0x20] sm:$0xff]  ;;  %v341_v13 = vld [vmem:[#allocation5 + $0x18] sm:$0xff]  ;;  %v425_v17 = vld [vmem:[#allocation5 + $0x90] sm:$0xff]  ;;  %s742_s25 = scalar_lea.sflag [#allocation4], %s1339_s11  ;;  %s1114_s16 = sshra.s32 %s757_s29, 4  ;;  %s1115_s16 = int_to_ptr.hbm [resolvable:$true] %s1114_s16 }
  0x3c   : > { %406 = vmatpush.msra.mxu1 %v384_v7  ;;  %451 = vmatpush.msra.mxu2 %v428_v5  ;;  %v382_v11 = vld [vmem:[#allocation5 + $0x60] sm:$0xff]  ;;  %v381_v14 = vld [vmem:[#allocation5 + $0x58] sm:$0xff]  ;;  %v340_v18 = vld [vmem:[#allocation5 + $0x10] sm:$0xff]  ;;  %s1120_s8 = scalar_lea.hbm %s1447_s6, 32  ;;  %p1121_p11 = scmp.lt.s32.totalorder %s1115_s16, %s1447_s6 }
  0x3d   : > { %362 = vmatpush.msra.mxu0 %v343_v6  ;;  %v322_v15 = vld [vmem:[%s1345_s18] sm:$0xff]  ;;  %v323_v16 = vld [vmem:[%s1345_s18 + $0x8] sm:$0xff]  ;;  %vm880_vm7 = vmneg %vm326_vm0  ;;  %s1116_s18 = scalar_lea.hbm %s1115_s16, 16 }
  0x3e   : > { %407 = vmatpush.msra.mxu1 %v383_v8  ;;  %452 = vmatpush.msra.mxu2 %v427_v9  ;;  %v327_v19 = vrot.slane %v322_v15, 7  ;;  %v328_v20 = vrot.slane %v323_v16, 7  ;;  %v1361_v21 = vld [vmem:[#allocation8 + $0x78] sm:$0xff]  ;;  %v380_v22 = vld [vmem:[#allocation5 + $0x50] sm:$0xff]  ;;  %v424_v24 = vld [vmem:[#allocation5 + $0x88] sm:$0xff]  ;;  %p1117_p1 = scmp.ne.s32.totalorder %s1115_s16, %s1116_s18  ;;  %p1122_p9 = scmp.lt.s32.totalorder %s1120_s8, %s1116_s18 }
  0x3f   : > { %363 = vmatpush.msra.mxu0 %v342_v10  ;;  %v1363_v23 = vld [vmem:[#allocation8 + $0x70] sm:$0xff]  ;;  %v339_v25 = vld [vmem:[#allocation5 + $0x8] sm:$0xff]  ;;  %488 = vmatpush.msra.mxu3 %v1361_v21  ;;  %v423_v34 = vld [vmem:[#allocation5 + $0x80] sm:$0xff] }
  0x40   : > { %408 = vmatpush.msra.mxu1 %v382_v11  ;;  %453 = vmatpush.msra.mxu2 %v426_v12  ;;  %v329_v26 = vsel %vm326_vm0, %v327_v19, %v328_v20  ;;  %v332_v27 = vsel %vm326_vm0, 0.0, %v327_v19  ;;  %v379_v30 = vld [vmem:[#allocation5 + $0x48] sm:$0xff]  ;;  %v338_v35 = vld [vmem:[#allocation5] sm:$0xff]  ;;  %v333_v38 = vsel %vm326_vm0, %v328_v20, 0.0  ;;  %v483_v41 = vld [vmem:[#allocation8 + $0x58] sm:$0xff]  ;;  %p1118_p4 = pnand %p1117_p1, %p1309_p3  ;;  %p1123_p2 = por %p1122_p9, %p1121_p11 }
  0x41   : > { %364 = vmatpush.msra.mxu0 %v341_v13  ;;  %v432_v28 = vrot.slane %v332_v27, 2  ;;  %v433_v29 = vrot.slane %v329_v26, 2  ;;  %v388_v31 = vrot.slane %v332_v27, 1  ;;  %v389_v32 = vrot.slane %v329_v26, 1  ;;  %v485_v33 = vld [vmem:[#allocation8 + $0x68] sm:$0xff]  ;;  %489 = vmatpush.msra.mxu3 %v1363_v23  ;;  %v378_v37 = vld [vmem:[#allocation5 + $0x40] sm:$0xff] }
  0x42   : > { %409 = vmatpush.msra.mxu1 %v381_v14  ;;  %454 = vmatpush.msra.mxu2 %v425_v17  ;;  %v484_v39 = vld [vmem:[#allocation8 + $0x60] sm:$0xff]  ;;  %v435_v42 = vrot.slane %v333_v38, 2  ;;  %v482_v43 = vld [vmem:[#allocation8 + $0x50] sm:$0xff]  ;;  %v391_v44 = vrot.slane %v333_v38, 1  ;;  %v481_v45 = vld [vmem:[#allocation8 + $0x48] sm:$0xff]  ;;  %p1119_p8 = pneg %p1118_p4 }
  0x43   : > { %365 = vmatpush.msra.mxu0 %v340_v18  ;;  %v434_v36 = vsel %vm431_vm1, %v432_v28, %v433_v29  ;;  %490 = vmatpush.msra.mxu3 %v485_v33  ;;  %v390_v40 = vsel %vm387_vm2, %v388_v31, %v389_v32  ;;  %v480_v47 = vld [vmem:[#allocation8 + $0x40] sm:$0xff]  ;;  %v479_v49 = vld [vmem:[#allocation8 + $0x38] sm:$0xff]  ;;  %v478_v50 = vld [vmem:[#allocation8 + $0x30] sm:$0xff] }
  0x44   : > { %410 = vmatpush.msra.mxu1 %v380_v22  ;;  %455 = vmatpush.msra.mxu2 %v424_v24  ;;  %v436_v46 = vsel %vm431_vm1, %v433_v29, %v435_v42  ;;  %v392_v48 = vsel %vm387_vm2, %v389_v32, %v391_v44  ;;  %v477_v51 = vld [vmem:[#allocation8 + $0x28] sm:$0xff]  ;;  %v476_v52 = vld [vmem:[#allocation8 + $0x20] sm:$0xff]  ;;  %v475_v53 = vld [vmem:[#allocation8 + $0x18] sm:$0xff]  ;;  %p1124_p10 = pnand %p1123_p2, %p1119_p8 }
  0x45   : > { %366 = vmatpush.msra.mxu0 %v339_v25  ;;  %491 = vmatpush.msra.mxu3 %v484_v39  ;;  %v474_v54 = vld [vmem:[#allocation8 + $0x10] sm:$0xff]  ;;  %v473_v55 = vld [vmem:[#allocation8 + $0x8] sm:$0xff]  ;;  %v472_v56 = vld [vmem:[#allocation8] sm:$0xff] }
  0x46   : > { %411 = vmatpush.msra.mxu1 %v379_v30  ;;  %456 = vmatpush.msra.mxu2 %v423_v34  ;;  %v562_v57 = vld [vmem:[#allocation7 + $0x78] sm:$0xff]  ;;  %v561_v58 = vld [vmem:[#allocation7 + $0x70] sm:$0xff]  ;;  %v560_v59 = vld [vmem:[#allocation7 + $0x68] sm:$0xff] }
  0x47   : > { %367 = vmatpush.msra.mxu0 %v338_v35  ;;  %878 = vmatmul.msk.f32.vlgmr.msra.gmra.mxu2 %vm346_vm3, %v434_v36  ;;  %v970_v60 = vld [vmem:[%s1443_s2] ss:$0 sm:$0xff]  ;;  %v558_v16 = vld [vmem:[#allocation7 + $0x58] sm:$0xff]  ;;  %v557_v17 = vld [vmem:[#allocation7 + $0x50] sm:$0xff] }
  0x48   : > { %874 = vmatmul.msk.f32.vlgmr.msra.gmra.mxu0 %vm346_vm3, %v332_v27  ;;  %412 = vmatpush.msra.mxu1 %v378_v37  ;;  %v559_v15 = vld [vmem:[#allocation7 + $0x60] sm:$0xff]  ;;  %v556_v18 = vld [vmem:[#allocation7 + $0x48] sm:$0xff]  ;;  %v604_v19 = vld [vmem:[#allocation7 + $0xf8] sm:$0xff] }
  0x49   : > { %876 = vmatmul.msk.f32.vlgmr.msra.gmra.mxu1 %vm346_vm3, %v390_v40  ;;  %492 = vmatpush.msra.mxu3 %v483_v41  ;;  %v655_v20 = vld [vmem:[#allocation7 + $0x178] sm:$0xff]  ;;  %v603_v22 = vld [vmem:[#allocation7 + $0xf0] sm:$0xff]  ;;  %v602_v25 = vld [vmem:[#allocation7 + $0xe8] sm:$0xff] }
  0x4a   : > { %563 = vmatpush.msrb.mxu0 %v562_v57  ;;  %614 = vmatpush.msrb.mxu1 %v604_v19  ;;  %v554_v24 = vld [vmem:[#allocation7 + $0x38] sm:$0xff]  ;;  %v553_v27 = vld [vmem:[#allocation7 + $0x30] sm:$0xff]  ;;  %v601_v28 = vld [vmem:[#allocation7 + $0xe0] sm:$0xff] }
  0x4b   : > { %493 = vmatpush.msra.mxu3 %v482_v43  ;;  %663 = vmatpush.msrb.mxu2 %v655_v20  ;;  %v652_v29 = vld [vmem:[#allocation7 + $0x160] sm:$0xff]  ;;  %v552_v30 = vld [vmem:[#allocation7 + $0x28] sm:$0xff]  ;;  %v600_v31 = vld [vmem:[#allocation7 + $0xd8] sm:$0xff] }
  0x4c   : > { %564 = vmatpush.msrb.mxu0 %v561_v58  ;;  %615 = vmatpush.msrb.mxu1 %v603_v22  ;;  %v651_v32 = vld [vmem:[#allocation7 + $0x158] sm:$0xff]  ;;  %v599_v34 = vld [vmem:[#allocation7 + $0xd0] sm:$0xff]  ;;  %v598_v37 = vld [vmem:[#allocation7 + $0xc8] sm:$0xff] }
  0x4d   : > { %494 = vmatpush.msra.mxu3 %v481_v45  ;;  %v650_v35 = vld [vmem:[#allocation7 + $0x150] sm:$0xff]  ;;  %v550_v36 = vld [vmem:[#allocation7 + $0x18] sm:$0xff]  ;;  %v649_v38 = vld [vmem:[#allocation7 + $0x148] sm:$0xff] }
  0x4e   : > { %565 = vmatpush.msrb.mxu0 %v560_v59  ;;  %616 = vmatpush.msrb.mxu1 %v602_v25  ;;  %v597_v40 = vld [vmem:[#allocation7 + $0xc0] sm:$0xff]  ;;  %v548_v42 = vld [vmem:[#allocation7 + $0x8] sm:$0xff]  ;;  %v647_v44 = vld [vmem:[#allocation7 + $0x138] sm:$0xff] }
  0x4f   : > { %879 = vmatmul.msk.f32.gmra.mxu2 %vm346_vm3, %v436_v46  ;;  %495 = vmatpush.msra.mxu3 %v480_v47  ;;  %v595_v46 = vld [vmem:[#allocation7 + $0xb0] sm:$0xff]  ;;  %v590_v58 = vld [vmem:[#allocation7 + $0x88] sm:$0xff] }
  0x50   : > { %875 = vmatmul.msk.f32.gmra.mxu0 %vm346_vm3, %v329_v26  ;;  %v653_v26 = vld [vmem:[#allocation7 + $0x168] sm:$0xff]  ;;  %617 = vmatpush.msrb.mxu1 %v601_v28 }
  0x51   : > { %877 = vmatmul.msk.f32.gmra.mxu1 %vm346_vm3, %v392_v48  ;;  %496 = vmatpush.msra.mxu3 %v479_v49  ;;  %v594_v48 = vld [vmem:[#allocation7 + $0xa8] sm:$0xff] }
  0x52   : > { %566 = vmatpush.msrb.mxu0 %v559_v15  ;;  %618 = vmatpush.msrb.mxu1 %v600_v31  ;;  %v641_v59 = vld [vmem:[#allocation7 + $0x108] sm:$0xff] }
  0x53   : > { %497 = vmatpush.msra.mxu3 %v478_v50 }
  0x54   : > { %567 = vmatpush.msrb.mxu0 %v558_v16  ;;  %619 = vmatpush.msrb.mxu1 %v599_v34 }
  0x55   : > { %498 = vmatpush.msra.mxu3 %v477_v51 }
  0x56   : > { %568 = vmatpush.msrb.mxu0 %v557_v17  ;;  %620 = vmatpush.msrb.mxu1 %v598_v37 }
  0x57   : > { %499 = vmatpush.msra.mxu3 %v476_v52 }
  0x58   : > { %569 = vmatpush.msrb.mxu0 %v556_v18  ;;  %621 = vmatpush.msrb.mxu1 %v597_v40 }
  0x59   : > { %500 = vmatpush.msra.mxu3 %v475_v53 }
  0x5b   : > { %501 = vmatpush.msra.mxu3 %v474_v54 }
  0x5d   : > { %502 = vmatpush.msra.mxu3 %v473_v55 }
  0x5f   : > { %503 = vmatpush.msra.mxu3 %v472_v56 }
  0x61   : > { %694 = vmatpush.msrb.mxu3 %v1361_v21  ;;  %v555_v21 = vld [vmem:[#allocation7 + $0x40] sm:$0xff] }
  0x62   : > { %570 = vmatpush.msrb.mxu0 %v555_v21 }
  0x63   : > { %695 = vmatpush.msrb.mxu3 %v1363_v23  ;;  %v654_v23 = vld [vmem:[#allocation7 + $0x170] sm:$0xff] }
  0x64   : > { %664 = vmatpush.msrb.mxu2 %v654_v23  ;;  %571 = vmatpush.msrb.mxu0 %v554_v24 }
  0x65   : > { %696 = vmatpush.msrb.mxu3 %v485_v33  ;;  %v551_v33 = vld [vmem:[#allocation7 + $0x20] sm:$0xff] }
  0x66   : > { %665 = vmatpush.msrb.mxu2 %v653_v26  ;;  %572 = vmatpush.msrb.mxu0 %v553_v27 }
  0x67   : > { %697 = vmatpush.msrb.mxu3 %v484_v39  ;;  %v549_v39 = vld [vmem:[#allocation7 + $0x10] sm:$0xff] }
  0x68   : > { %666 = vmatpush.msrb.mxu2 %v652_v29  ;;  %573 = vmatpush.msrb.mxu0 %v552_v30 }
  0x69   : > { %698 = vmatpush.msrb.mxu3 %v483_v41  ;;  %v648_v41 = vld [vmem:[#allocation7 + $0x140] sm:$0xff] }
  0x6a   : > { %667 = vmatpush.msrb.mxu2 %v651_v32  ;;  %574 = vmatpush.msrb.mxu0 %v551_v33  ;;  %v971_v32 = vld [vmem:[%s1445_s4] ss:$0 sm:$0xff] }
  0x6b   : > { %699 = vmatpush.msrb.mxu3 %v482_v43  ;;  %v596_v43 = vld [vmem:[#allocation7 + $0xb8] sm:$0xff] }
  0x6c   : > { %668 = vmatpush.msrb.mxu2 %v650_v35  ;;  %575 = vmatpush.msrb.mxu0 %v550_v36 }
  0x6d   : > { %700 = vmatpush.msrb.mxu3 %v481_v45  ;;  %622 = vmatpush.msrb.mxu1 %v596_v43  ;;  %v547_v45 = vld [vmem:[#allocation7] sm:$0xff] }
  0x6e   : > { %669 = vmatpush.msrb.mxu2 %v649_v38  ;;  %576 = vmatpush.msrb.mxu0 %v549_v39 }
  0x6f   : > { %701 = vmatpush.msrb.mxu3 %v480_v47  ;;  %v646_v47 = vld [vmem:[#allocation7 + $0x130] sm:$0xff]  ;;  %623 = vmatpush.msrb.mxu1 %v595_v46 }
  0x70   : > { %670 = vmatpush.msrb.mxu2 %v648_v41  ;;  %577 = vmatpush.msrb.mxu0 %v548_v42 }
  0x71   : > { %702 = vmatpush.msrb.mxu3 %v479_v49  ;;  %v645_v49 = vld [vmem:[#allocation7 + $0x128] sm:$0xff]  ;;  %624 = vmatpush.msrb.mxu1 %v594_v48 }
  0x72   : > { %671 = vmatpush.msrb.mxu2 %v647_v44  ;;  %578 = vmatpush.msrb.mxu0 %v547_v45 }
  0x73   : > { %703 = vmatpush.msrb.mxu3 %v478_v50  ;;  %v593_v50 = vld [vmem:[#allocation7 + $0xa0] sm:$0xff] }
  0x74   : > { %672 = vmatpush.msrb.mxu2 %v646_v47  ;;  %625 = vmatpush.msrb.mxu1 %v593_v50 }
  0x75   : > { %704 = vmatpush.msrb.mxu3 %v477_v51  ;;  %v644_v51 = vld [vmem:[#allocation7 + $0x120] sm:$0xff] }
  0x76   : > { %673 = vmatpush.msrb.mxu2 %v645_v49 }
  0x77   : > { %705 = vmatpush.msrb.mxu3 %v476_v52  ;;  %v592_v52 = vld [vmem:[#allocation7 + $0x98] sm:$0xff] }
  0x78   : > { %674 = vmatpush.msrb.mxu2 %v644_v51  ;;  %626 = vmatpush.msrb.mxu1 %v592_v52 }
  0x79   : > { %706 = vmatpush.msrb.mxu3 %v475_v53  ;;  %v643_v53 = vld [vmem:[#allocation7 + $0x118] sm:$0xff] }
  0x7a   : > { %675 = vmatpush.msrb.mxu2 %v643_v53 }
  0x7b   : > { %707 = vmatpush.msrb.mxu3 %v474_v54  ;;  %v591_v54 = vld [vmem:[#allocation7 + $0x90] sm:$0xff] }
  0x7c   : > { %627 = vmatpush.msrb.mxu1 %v591_v54 }
  0x7d   : > { %708 = vmatpush.msrb.mxu3 %v473_v55  ;;  %v642_v55 = vld [vmem:[#allocation7 + $0x110] sm:$0xff] }
  0x7e   : > { %676 = vmatpush.msrb.mxu2 %v642_v55  ;;  %628 = vmatpush.msrb.mxu1 %v590_v58 }
  0x7f   : > { %709 = vmatpush.msrb.mxu3 %v472_v56 }
  0x80   : > { %677 = vmatpush.msrb.mxu2 %v641_v59 }
  0xc5   : > { %v369_v61 = vpop.f32.mrf.mxu0 }
  0xc6   : > { %v375_v62 = vadd.f32 %v970_v60, %v369_v61  ;;  %v414_v63 = vpop.f32.mrf.mxu1  ;;  %v640_v61 = vld [vmem:[#allocation7 + $0x100] sm:$0xff] }
  0xc7   : > { %678 = vmatpush.msrb.mxu2 %v640_v61 }
  0xc8   : > { %v420_v0 = vadd.f32 %v414_v63, %v375_v62 }
  0xca   : > { %v458_v1 = vpop.f32.mrf.mxu2 }
  0xcb   : > { %v464_v2 = vadd.f32 %v458_v1, %v420_v0 }
  0xcd   : > { %v372_v3 = vpop.f32.mrf.mxu0  ;;  %v466_v4 = vmul.f32 0.2, %v464_v2 }
  0xce   : > { %v376_v5 = vadd.f32 %v970_v60, %v372_v3  ;;  %v417_v6 = vpop.f32.mrf.mxu1  ;;  %v589_v60 = vld [vmem:[#allocation7 + $0x80] sm:$0xff] }
  0xcf   : > { %v1385_v7 = vmax.f32 %v464_v2, %v466_v4  ;;  %629 = vmatpush.msrb.mxu1 %v589_v60 }
  0xd0   : > { %v421_v8 = vadd.f32 %v417_v6, %v376_v5 }
  0xd1   : > { %v470_v9 = vmul.f32 %v1385_v7, %v1385_v7 }
  0xd2   : > { %v461_v10 = vpop.f32.mrf.mxu2 }
  0xd3   : > { %v465_v11 = vadd.f32 %v461_v10, %v421_v8  ;;  %504 = vmatmul.f32.vlgmr.msra.gmra.mxu3 %v470_v9 }
  0xd5   : > { %v467_v12 = vmul.f32 0.2, %v465_v11 }
  0xd7   : > { %v1389_v13 = vmax.f32 %v465_v11, %v467_v12 }
  0xd9   : > { %v471_v14 = vmul.f32 %v1389_v13, %v1389_v13 }
  0xdb   : > { %507 = vmatmul.f32.gmra.mxu3 %v471_v14 }
 0x156   : > { %v505_v56 = vpop.f32.mrf.mxu3 }
 0x157   : > { %v506_v57 = vadd.f32 1e-08, %v505_v56 }
 0x159   : > { %972 = vrsqrt.f32 %v506_v57  ;;  %vm517_vm5 = vweird.f32 %v506_v57 }
 0x15e   : > { %v508_v62 = vpop.f32.mrf.mxu3 }
 0x15f   : > { %v973_v63 = vpop.eup %972  ;;  %v509_v0 = vadd.f32 1e-08, %v508_v62 }
 0x160   : > { %v512_v1 = vmul.f32 %v973_v63, %v506_v57  ;;  %vm518_vm4 = vweird.f32 %v973_v63 }
 0x161   : > { %974 = vrsqrt.f32 %v509_v0  ;;  %vm519_vm6 = vmor %vm517_vm5, %vm518_vm4  ;;  %vm527_vm9 = vweird.f32 %v509_v0 }
 0x162   : > { %v513_v2 = vmul.f32 %v973_v63, %v512_v1 }
 0x164   : > { %v514_v3 = vmul.f32 0.5, %v513_v2 }
 0x166   : > { %v515_v4 = vsub.f32 1.5, %v514_v3 }
 0x167   : > { %v975_v5 = vpop.eup %974 }
 0x168   : > { %v516_v6 = vmul.f32 %v973_v63, %v515_v4  ;;  %v522_v8 = vmul.f32 %v975_v5, %v509_v0  ;;  %vm528_vm8 = vweird.f32 %v975_v5 }
 0x169   : > { %vm529_vm10 = vmor %vm527_vm9, %vm528_vm8 }
 0x16a   : > { %v520_v9 = vsel %vm519_vm6, %v973_v63, %v516_v6  ;;  %v523_v10 = vmul.f32 %v975_v5, %v522_v8 }
 0x16b   : > { %v531_v11 = vmul.f32 %v520_v9, %v1385_v7 }
 0x16c   : > { %v524_v12 = vmul.f32 0.5, %v523_v10 }
 0x16d   : > { %v535_v14 = vrot.slane %v531_v11, 7 }
 0x16e   : > { %v525_v15 = vsub.f32 1.5, %v524_v12 }
 0x16f   : > { %881 = vmatmul.msk.f32.vlgmr.msrb.gmra.mxu0 %vm880_vm7, %v535_v14  ;;  %v541_v20 = vsel %vm326_vm0, 0.0, %v535_v14 }
 0x170   : > { %v526_v16 = vmul.f32 %v975_v5, %v525_v15  ;;  %v607_v23 = vrot.slane %v541_v20, 1  ;;  %v656_v24 = vrot.slane %v541_v20, 2 }
 0x172   : > { %v530_v17 = vsel %vm529_vm10, %v975_v5, %v526_v16 }
 0x173   : > { %v532_v18 = vmul.f32 %v530_v17, %v1389_v13 }
 0x175   : > { %v536_v19 = vrot.slane %v532_v18, 7 }
 0x177   : > { %v537_v21 = vsel %vm326_vm0, %v535_v14, %v536_v19  ;;  %v542_v27 = vsel %vm326_vm0, %v536_v19, 0.0 }
 0x178   : > { %582 = vmatmul.f32.gmra.mxu0 %v537_v21  ;;  %v608_v7 = vrot.slane %v537_v21, 1  ;;  %v657_v22 = vrot.slane %v537_v21, 2  ;;  %v610_v28 = vrot.slane %v542_v27, 1  ;;  %v659_v13 = vrot.slane %v542_v27, 2 }
 0x17a   : > { %v609_v25 = vsel %vm387_vm2, %v607_v23, %v608_v7  ;;  %v658_v26 = vsel %vm431_vm1, %v656_v24, %v657_v22  ;;  %v611_v29 = vsel %vm387_vm2, %v608_v7, %v610_v28  ;;  %v660_v30 = vsel %vm431_vm1, %v657_v22, %v659_v13 }
 0x17b   : > { %630 = vmatmul.f32.vlgmr.msrb.gmra.mxu1 %v609_v25  ;;  %679 = vmatmul.f32.vlgmr.msrb.gmra.mxu2 %v658_v26 }
 0x183   : > { %633 = vmatmul.f32.gmra.mxu1 %v611_v29  ;;  %682 = vmatmul.f32.gmra.mxu2 %v660_v30 }
 0x1ec   : > { %v580_v31 = vpop.f32.mrf.mxu0 }
 0x1ed   : > { %v586_v34 = vadd.f32 %v971_v32, %v580_v31 }
 0x1f5   : > { %v583_v38 = vpop.f32.mrf.mxu0 }
 0x1f6   : > { %v587_v41 = vadd.f32 %v971_v32, %v583_v38 }
 0x1f8   : > { %v631_v33 = vpop.f32.mrf.mxu1 }
 0x1f9   : > { %v637_v35 = vadd.f32 %v631_v33, %v586_v34 }
 0x1fe   : > { %v680_v36 = vpop.f32.mrf.mxu2 }
 0x1ff   : > { %v686_v37 = vadd.f32 %v680_v36, %v637_v35 }
 0x200   : > { %v634_v40 = vpop.f32.mrf.mxu1 }
 0x201   : > { %v688_v39 = vmul.f32 0.2, %v686_v37  ;;  %v638_v43 = vadd.f32 %v634_v40, %v587_v41 }
 0x203   : > { %v690_v42 = vmax.f32 %v686_v37, %v688_v39 }
 0x205   : > { %v692_v44 = vmul.f32 %v690_v42, %v690_v42 }
 0x206   : > { %v683_v45 = vpop.f32.mrf.mxu2 }
 0x207   : > { %v687_v46 = vadd.f32 %v683_v45, %v638_v43  ;;  %710 = vmatmul.f32.vlgmr.msrb.gmra.mxu3 %v692_v44 }
 0x209   : > { %v689_v47 = vmul.f32 0.2, %v687_v46 }
 0x20b   : > { %v691_v48 = vmax.f32 %v687_v46, %v689_v47 }
 0x20d   : > { %v693_v49 = vmul.f32 %v691_v48, %v691_v48 }
 0x20f   : > { %713 = vmatmul.f32.gmra.mxu3 %v693_v49 }
 0x28a   : > { %v711_v50 = vpop.f32.mrf.mxu3 }
 0x28b   : > { %v712_v51 = vadd.f32 1e-08, %v711_v50 }
 0x28d   : > { %976 = vrsqrt.f32 %v712_v51  ;;  %vm723_vm12 = vweird.f32 %v712_v51 }
 0x292   : > { %v714_v52 = vpop.f32.mrf.mxu3 }
 0x293   : > { %v977_v53 = vpop.eup %976  ;;  %v715_v54 = vadd.f32 1e-08, %v714_v52 }
 0x294   : > { %v718_v55 = vmul.f32 %v977_v53, %v712_v51  ;;  %vm724_vm11 = vweird.f32 %v977_v53 }
 0x295   : > { %978 = vrsqrt.f32 %v715_v54  ;;  %vm725_vm13 = vmor %vm723_vm12, %vm724_vm11  ;;  %vm733_vm15 = vweird.f32 %v715_v54 }
 0x296   : > { %v719_v56 = vmul.f32 %v977_v53, %v718_v55 }
 0x298   : > { %v720_v57 = vmul.f32 0.5, %v719_v56 }
 0x29a   : > { %v721_v58 = vsub.f32 1.5, %v720_v57 }
 0x29b   : > { %v979_v59 = vpop.eup %978 }
 0x29c   : > { %v722_v60 = vmul.f32 %v977_v53, %v721_v58  ;;  %v728_v61 = vmul.f32 %v979_v59, %v715_v54  ;;  %vm734_vm14 = vweird.f32 %v979_v59 }
 0x29d   : > { %vm735_vm0 = vmor %vm733_vm15, %vm734_vm14 }
 0x29e   : > { %v726_v62 = vsel %vm725_vm13, %v977_v53, %v722_v60  ;;  %v729_v63 = vmul.f32 %v979_v59, %v728_v61 }
 0x29f   : > { %v737_v0 = vmul.f32 %v726_v62, %v690_v42 }
 0x2a0   : > { %v730_v1 = vmul.f32 0.5, %v729_v63 }
 0x2a1   : > { %739 = vst [vmem:[%s321_s20] sm:$0xff] %v737_v0 }
 0x2a2   : > { %v731_v2 = vsub.f32 1.5, %v730_v1 }
 0x2a4   : > { %v732_v3 = vmul.f32 %v979_v59, %v731_v2 }
 0x2a6   : > { %v736_v4 = vsel %vm735_vm0, %v979_v59, %v732_v3 }
 0x2a7   : > { %v738_v5 = vmul.f32 %v736_v4, %v691_v48 }
 0x2a9   : > { %740 = vst [vmem:[%s321_s20 + $0x8] sm:$0xff] %v738_v5 }
 0x2aa   : > { %1127 = shalt.err (!%p1124_p10)
}
 0x2ab   : > { %s1181_s11 = smov 128   ;;  %s1182_s9 = smov 8  }
 0x2ac   : > { %903 = dma.vmem_to_hbm [thread:$0]  (%p1309_p3), %s755_s14, 256, %s757_s29, %s742_s25, %s1181_s11, %s1181_s11, %s1182_s9  }
 0x2ad PF: > { %s771_s10 = sand.u32 1, %s1162_s21   ;;  %p1458_p12 = scmp.ge.s32.totalorder %s1174_s24, 2 }
 0x2ae   : > { %s772_s17 = scalar_lea.sflag [#allocation4], %s771_s10 }
 0x2af   : > { %p920_p13 = pnand %p1458_p12, %p1253_p6 }
 0x2b1   : > { %p921_p0 = pneg %p920_p13 }
 0x2b3   : > { %1157 = dma.done.wait (%p921_p0), %s772_s17, 256  }
 0x2b4   : > { %1159 = vsyncadd (%p921_p0), %s772_s17, 4294967040  ;;  %p21_p5 = scmp.ge.s32.totalorder %s1291_s7, 4   ;;  %s1459_s21 = smov %s1166_s22 }
 0x2b5   : > { %s1460_s22 = smov %s1170_s23  ;;  %s1461_s23 = smov %s1305_s12 }
 0x2b6   : > { %s1462_s24 = smov %s1291_s7  ;;  %23 = sbr.rel (!%p21_p5) target bundleno = 7 (0x7), region = 105 }
 0x2bb   :  { %778 = vsyncpa [#allocation3], 1 }
 0x2bc   :  { %780 = vsyncpa [#allocation3 + $0x1], 1 }
 0x2bd   :  { %781 = vsyncpa [#allocation6], 1 }
 0x2be   :  { %782 = vsyncpa [#allocation9], 1 }
 0x2bf   :  { %783 = vsyncpa [#allocation4], 1 }
 0x2c0   :  { %785 = vsyncpa [#allocation4 + $0x1], 1 }

</bundles_post_ra>
